<compile_context>
chip_gen: v6e
topology: v6e:2x2x1
jax: 0.10.0
libtpu: 0.0.40
codegen_flags: <defaults>
</compile_context>

<pallas_src>
import functools

import jax
import jax.numpy as jnp
import numpy as np
from jax.experimental import pallas as pl
from jax.experimental.pallas import tpu as pltpu


# ----------------------------------------------------------------------------
# helpers
# ----------------------------------------------------------------------------
def _round_up(x, m):
    return ((x + m - 1) // m) * m


def _cdiv(a, b):
    return -(-a // b)


def _pick_tile(total, candidates):
    for c in candidates:
        if total % c == 0:
            return c
    return total


def adopt_weight(weight, global_step, threshold=0, value=0.0, step_each=1):
    # jnp-based so it also works with a traced global_step under jit.
    use = jnp.logical_and(global_step >= threshold, (global_step % step_each) == 0)
    return jnp.where(use, weight, value)


# ----------------------------------------------------------------------------
# Pallas kernel: tiled bf16 matmul + bias + optional LeakyReLU (+ fused BN stats)
#   A: (M, K) bf16 im2col patches, B: (K, Cout) bf16 weights
#   grid = (M/TM, Np/TN, K/TK); f32 accumulation; epilogue at the last K step.
# ----------------------------------------------------------------------------
def _conv_matmul_kernel(a_ref, b_ref, bias_ref, o_ref, *rest,
                        act, compute_stats, M, TM, num_k):
    # All program ids are read at the top level of the kernel body (never inside a
    # pl.when closure — nested cond jaxprs keep program_id un-lowered on CPU).
    i = pl.program_id(0)
    if num_k > 1:
        k = pl.program_id(2)
        acc_ref = rest[-1]
        stats_rest = rest[:-1]
    else:
        k = None
        acc_ref = None
        stats_rest = rest
    stats_ref = stats_rest[0] if compute_stats else None

    def epilogue(acc_f32):
        y = acc_f32 + bias_ref[...]                     # (TM, TN), bias broadcasts
        if act == "lrelu":
            y = jnp.where(y >= 0.0, y, 0.2 * y)
        o_ref[...] = y.astype(o_ref.dtype)
        if compute_stats:
            # Per-M-tile column sum / sum-of-squares (rows beyond M masked), so
            # BatchNorm batch stats need no extra pass over y in HBM.
            rows = jax.lax.broadcasted_iota(jnp.int32, y.shape, 0) + i * TM
            ym = jnp.where(rows < M, y, 0.0)
            s0 = jnp.sum(ym, axis=0, keepdims=True)        # (1, TN)
            s1 = jnp.sum(ym * ym, axis=0, keepdims=True)   # (1, TN)
            rid = jax.lax.broadcasted_iota(jnp.int32, (2, y.shape[1]), 0)
            stats_ref[...] = jnp.where(rid == 0, s0, s1)[None, :, :]   # (1, 2, TN)

    if num_k == 1:
        # Single K step: no VMEM accumulator, no pl.when — write the result directly.
        epilogue(jnp.dot(a_ref[...], b_ref[...], preferred_element_type=jnp.float32))
    else:
        @pl.when(k == 0)
        def _():
            acc_ref[...] = jnp.zeros_like(acc_ref)

        acc_ref[...] += jnp.dot(a_ref[...], b_ref[...],
                                preferred_element_type=jnp.float32)

        @pl.when(k == num_k - 1)
        def _():
            epilogue(acc_ref[...])


def pallas_conv_matmul(a, b, bias, act="none", compute_stats=False,
                       out_dtype=jnp.bfloat16):
    """a: (M, K) bf16, b: (K, Cout) bf16, bias: (Cout,) f32.
    Returns y: (M, Np) out_dtype with Np = round_up(Cout, 128) (caller slices).
    If compute_stats: also returns (num_m, 2, Np) f32 with row 0 = column sums and
    row 1 = column sums-of-squares of the (activated) output, per M tile."""
    M, K = a.shape
    Kb, Cout = b.shape
    assert K == Kb and K % 128 == 0, "K must be a multiple of 128 (pad Cin to even)"

    Np = _round_up(Cout, 128)
    if Np != Cout:   # only the (small) weight / bias get padded, never the patches
        b = jnp.zeros((K, Np), b.dtype).at[:, :Cout].set(b)
    bias_p = jnp.zeros((1, Np), jnp.float32).at[0, :Cout].set(bias.astype(jnp.float32))

    # TM=1024 amortizes per-grid-step overhead; TK capped at 1024 keeps double-
    # buffered residency ~5-6 MiB, under even v5e's 16 MiB scoped-VMEM default.
    TM = min(1024, _round_up(M, 8))
    TN = _pick_tile(Np, (256, 128))
    TK = _pick_tile(K, (1024, 512, 256, 128))
    num_m, num_n, num_k = _cdiv(M, TM), Np // TN, K // TK

    kernel = functools.partial(_conv_matmul_kernel, act=act,
                               compute_stats=compute_stats, M=M, TM=TM, num_k=num_k)
    out_shape = jax.ShapeDtypeStruct((M, Np), out_dtype)
    out_spec = pl.BlockSpec((TM, TN), lambda i, j, k: (i, j))
    if compute_stats:
        out_shape = (out_shape, jax.ShapeDtypeStruct((num_m, 2, Np), jnp.float32))
        out_spec = (out_spec, pl.BlockSpec((1, 2, TN), lambda i, j, k: (i, 0, j)))

    scratch = [] if num_k == 1 else [pltpu.VMEM((TM, TN), jnp.float32)]
    return pl.pallas_call(
        kernel,
        out_shape=out_shape,
        grid=(num_m, num_n, num_k),
        in_specs=[
            pl.BlockSpec((TM, TK), lambda i, j, k: (i, k)),
            pl.BlockSpec((TK, TN), lambda i, j, k: (k, j)),
            pl.BlockSpec((1, TN), lambda i, j, k: (0, j)),
        ],
        out_specs=out_spec,
        scratch_shapes=scratch,
        compiler_params=pltpu.CompilerParams(
            dimension_semantics=("parallel", "parallel", "arbitrary")),
    )(a, b, bias_p)


# ----------------------------------------------------------------------------
# Pallas kernel: fused BatchNorm(apply) + LeakyReLU(0.2), tiled over rows
# ----------------------------------------------------------------------------
def _scale_shift_lrelu_kernel(x_ref, sc_ref, sh_ref, o_ref):
    y = x_ref[...].astype(jnp.float32) * sc_ref[...] + sh_ref[...]
    o_ref[...] = jnp.where(y >= 0.0, y, 0.2 * y).astype(o_ref.dtype)


def pallas_scale_shift_lrelu(x, scale, shift, out_dtype=jnp.bfloat16):
    """x: (M, N) bf16 (N multiple of 128), scale/shift: (N,) -> LeakyReLU(x*s+t)."""
    M, N = x.shape
    TM = min(1024, _round_up(M, 8))
    num_m = _cdiv(M, TM)
    return pl.pallas_call(
        _scale_shift_lrelu_kernel,
        out_shape=jax.ShapeDtypeStruct((M, N), out_dtype),
        grid=(num_m,),
        in_specs=[
            pl.BlockSpec((TM, N), lambda i: (i, 0)),
            pl.BlockSpec((1, N), lambda i: (0, 0)),
            pl.BlockSpec((1, N), lambda i: (0, 0)),
        ],
        out_specs=pl.BlockSpec((TM, N), lambda i: (i, 0)),
        compiler_params=pltpu.CompilerParams(dimension_semantics=("parallel",)),
    )(x, scale.reshape(1, N).astype(jnp.float32),
      shift.reshape(1, N).astype(jnp.float32))


# ----------------------------------------------------------------------------
# Pallas kernel: Dice loss (sigmoid), MONAI defaults
#   smooth_nr = smooth_dr = 1e-5, squared_pred=False, reduction="mean".
#   Grid = (S_outer parallel, S_inner arbitrary); per-outer partial (R,1) sums
#   accumulate in resident output blocks; tiny JAX epilogue combines them.
# ----------------------------------------------------------------------------
def _dice_partial_kernel(p_ref, t_ref, inter_ref, po_ref, go_ref, *, S, TS, inner):
    io = pl.program_id(0)
    ii = pl.program_id(1)
    j = io * inner + ii   # global tile index along S

    @pl.when(ii == 0)
    def _():
        inter_ref[...] = jnp.zeros_like(inter_ref)
        po_ref[...] = jnp.zeros_like(po_ref)
        go_ref[...] = jnp.zeros_like(go_ref)

    cols = jax.lax.broadcasted_iota(jnp.int32, p_ref.shape, 1) + j * TS
    valid = cols < S            # masks both the ragged last tile and overflow tiles
    p = jnp.where(valid, jax.nn.sigmoid(p_ref[...]), 0.0)
    t = jnp.where(valid, t_ref[...], 0.0)
    inter_ref[...] += jnp.sum(p * t, axis=1, keepdims=True)[None]
    po_ref[...] += jnp.sum(p, axis=1, keepdims=True)[None]
    go_ref[...] += jnp.sum(t, axis=1, keepdims=True)[None]


def pallas_dice_loss_sigmoid(pred, target, smooth_nr=1e-5, smooth_dr=1e-5):
    """pred/target: (B, C, *spatial). Returns scalar dice loss."""
    B, C = pred.shape[:2]
    R = B * C
    S = int(np.prod(pred.shape[2:]))
    p2 = pred.reshape(R, S).astype(jnp.float32)
    t2 = target.reshape(R, S).astype(jnp.float32)

    # ~2 MiB per input block: fits v5e's 16 MiB scoped-VMEM default with 2 inputs
    # double-buffered; still near the HBM roofline on v6e/v7x.
    lane_budget = max(128, (2 * 1024 * 1024 // (4 * R)) // 128 * 128)
    TS = min(lane_budget, _round_up(S, 128))
    num_s = _cdiv(S, TS)
    # Outer "parallel" axis so v7x's two TensorCores both get work (no-op on
    # v5e/v6e); overflow tiles of the uneven split are masked inside the kernel
    # and the index_map clamps the block index so no OOB block is ever fetched.
    outer = 2 if num_s >= 2 else 1
    inner = _cdiv(num_s, outer)
    in_map = lambda io, ii: (0, jnp.minimum(io * inner + ii, num_s - 1))

    inter, po, go = pl.pallas_call(
        functools.partial(_dice_partial_kernel, S=S, TS=TS, inner=inner),
        out_shape=(jax.ShapeDtypeStruct((outer, R, 1), jnp.float32),) * 3,
        grid=(outer, inner),
        in_specs=[pl.BlockSpec((R, TS), in_map),
                  pl.BlockSpec((R, TS), in_map)],
        out_specs=(pl.BlockSpec((1, R, 1), lambda io, ii: (io, 0, 0)),) * 3,
        compiler_params=pltpu.CompilerParams(
            dimension_semantics=("parallel", "arbitrary")),
    )(p2, t2)
    inter = jnp.sum(inter, axis=0)
    po = jnp.sum(po, axis=0)
    go = jnp.sum(go, axis=0)
    f = 1.0 - (2.0 * inter + smooth_nr) / (po + go + smooth_dr)
    return jnp.mean(f)


# ----------------------------------------------------------------------------
# Pallas kernels: logits statistics (mean-only and mean+hinge)
# ----------------------------------------------------------------------------
def _flatten_pad_2d(x, lanes=128):
    flat = x.reshape(-1).astype(jnp.float32)
    n = flat.shape[0]
    rows = max(1, _cdiv(n, lanes))
    pad = rows * lanes - n
    if pad:
        flat = jnp.concatenate([flat, jnp.zeros((pad,), jnp.float32)])
    return flat.reshape(rows, lanes), n


def _mean_kernel(x_ref, o_ref, *, n):
    o_ref[...] = jnp.reshape(jnp.sum(x_ref[...]) * (1.0 / float(n)), (1, 1))


def pallas_mean(x):
    x2, n = _flatten_pad_2d(x)   # padded entries are zero -> do not affect the sum
    out = pl.pallas_call(
        functools.partial(_mean_kernel, n=n),
        out_shape=jax.ShapeDtypeStruct((1, 1), jnp.float32),
        grid=(1,),
        in_specs=[pl.BlockSpec(x2.shape, lambda i: (0, 0))],
        out_specs=pl.BlockSpec((1, 1), lambda i: (0, 0)),
    )(x2)
    return out[0, 0]


def _logits_stats_kernel(lr_ref, lf_ref, mr_ref, mf_ref, h_ref, *, n):
    lr = lr_ref[...]
    lf = lf_ref[...]
    rows = jax.lax.broadcasted_iota(jnp.int32, lr.shape, 0)
    cols = jax.lax.broadcasted_iota(jnp.int32, lr.shape, 1)
    valid = (rows * lr.shape[1] + cols) < n
    inv_n = 1.0 / float(n)
    mr_ref[...] = jnp.reshape(jnp.sum(jnp.where(valid, lr, 0.0)) * inv_n, (1, 1))
    mf_ref[...] = jnp.reshape(jnp.sum(jnp.where(valid, lf, 0.0)) * inv_n, (1, 1))
    hinge = 0.5 * (jnp.sum(jnp.where(valid, jnp.maximum(1.0 - lr, 0.0), 0.0)) * inv_n
                   + jnp.sum(jnp.where(valid, jnp.maximum(1.0 + lf, 0.0), 0.0)) * inv_n)
    h_ref[...] = jnp.reshape(hinge, (1, 1))


def pallas_logits_stats(logits_real, logits_fake):
    lr2, n = _flatten_pad_2d(logits_real)
    lf2, n2 = _flatten_pad_2d(logits_fake)
    assert n == n2
    mr, mf, h = pl.pallas_call(
        functools.partial(_logits_stats_kernel, n=n),
        out_shape=(jax.ShapeDtypeStruct((1, 1), jnp.float32),) * 3,
        grid=(1,),
        in_specs=[pl.BlockSpec(lr2.shape, lambda i: (0, 0)),
                  pl.BlockSpec(lf2.shape, lambda i: (0, 0))],
        out_specs=(pl.BlockSpec((1, 1), lambda i: (0, 0)),) * 3,
    )(lr2, lf2)
    return mr[0, 0], mf[0, 0], h[0, 0]


# ----------------------------------------------------------------------------
# NLayer3DDiscriminator (PatchGAN-3D), channels-last bf16 activations
# ----------------------------------------------------------------------------
def im2col_3d_cl(x, k, stride, pad):
    """x: (B, D, H, W, C) channels-last bf16 -> patches (B*Do*Ho*Wo, k^3*C),
    per-voxel feature order (kz, ky, kx, C)."""
    B, D, H, W, C = x.shape
    xp = jnp.pad(x, ((0, 0), (pad, pad), (pad, pad), (pad, pad), (0, 0)))
    Do = (D + 2 * pad - k) // stride + 1
    Ho = (H + 2 * pad - k) // stride + 1
    Wo = (W + 2 * pad - k) // stride + 1
    # TODO(synk): fuse this patch extraction into the matmul kernel (keep x in HBM
    # via BlockSpec(memory_space=pl.ANY) and DMA the TM-row window + halo per tile,
    # or drive the K grid axis over the 64 taps) so the 64x-expanded patch matrix
    # is never materialized in HBM — the remaining dominant traffic term.
    slices = []
    for dz in range(k):
        for dy in range(k):
            for dx in range(k):
                slices.append(
                    xp[:,
                       dz:dz + stride * Do:stride,
                       dy:dy + stride * Ho:stride,
                       dx:dx + stride * Wo:stride, :])
    p = jnp.stack(slices, axis=4)                       # (B, Do, Ho, Wo, k^3, C)
    return p.reshape(B * Do * Ho * Wo, k * k * k * C), (Do, Ho, Wo)


def init_discriminator_params(key, input_nc=3, ndf=8, n_layers=2):
    """weights_init parity: conv ~ N(0, 0.02), bias 0, BN gamma ~ N(1, 0.02), beta 0.
    use_actnorm=False => BatchNorm3d (bias=False on BN convs)."""
    kw = 4
    cfg = [(input_nc, ndf, 2, False)]       # (cin, cout, stride, has_bn)
    nf_mult = 1
    for n in range(1, n_layers):
        nf_mult_prev = nf_mult
        nf_mult = min(2 ** n, 8)
        cfg.append((ndf * nf_mult_prev, ndf * nf_mult, 2, True))
    nf_mult_prev = nf_mult
    nf_mult = min(2 ** n_layers, 8)
    cfg.append((ndf * nf_mult_prev, ndf * nf_mult, 1, True))
    cfg.append((ndf * nf_mult, 1, 1, False))

    weights, static_cfg = [], []
    for (cin, cout, stride, has_bn) in cfg:
        key, k_w, k_g = jax.random.split(key, 3)
        layer = {
            "w": 0.02 * jax.random.normal(k_w, (cout, cin, kw, kw, kw), jnp.float32),
            "b": jnp.zeros((cout,), jnp.float32),
        }
        if has_bn:
            layer["gamma"] = 1.0 + 0.02 * jax.random.normal(k_g, (cout,), jnp.float32)
            layer["beta"] = jnp.zeros((cout,), jnp.float32)
        weights.append(layer)
        static_cfg.append((stride, has_bn))
    return weights, tuple(static_cfg)


def discriminator_forward(weights, cfg, x_ncdhw):
    """x_ncdhw: (B, C, D, H, W) -> logits (B, Do, Ho, Wo, 1) channels-last f32."""
    # Entry NCDHW -> NDHWC transpose folded with the bf16 cast into one pass.
    x = jnp.transpose(x_ncdhw, (0, 2, 3, 4, 1)).astype(jnp.bfloat16)
    n_total = len(cfg)
    for i, ((stride, has_bn), layer) in enumerate(zip(cfg, weights)):
        B = x.shape[0]
        cin = x.shape[-1]
        cout = layer["w"].shape[0]
        w = layer["w"]
        if cin % 2 == 1:
            # Pad the (cheap) channel dim so K = 64*Cin is a multiple of 128; this
            # avoids padding the 64x larger im2col patch matrix instead.
            x = jnp.pad(x, ((0, 0),) * 4 + ((0, 1),))
            w = jnp.pad(w, ((0, 0), (0, 1), (0, 0), (0, 0), (0, 0)))
            cin += 1

        patches, (Do, Ho, Wo) = im2col_3d_cl(x, k=4, stride=stride, pad=1)  # bf16
        Kdim = 64 * cin
        wm = jnp.transpose(w, (2, 3, 4, 1, 0)).reshape(Kdim, cout).astype(jnp.bfloat16)

        is_last = (i == n_total - 1)
        if has_bn:
            # Conv matmul with fused per-tile column stats (no extra pass over y).
            y, stats = pallas_conv_matmul(patches, wm, layer["b"], act="none",
                                          compute_stats=True, out_dtype=jnp.bfloat16)
            M = patches.shape[0]
            Np = y.shape[1]
            csum = jnp.sum(stats[:, 0, :], axis=0)
            csq = jnp.sum(stats[:, 1, :], axis=0)
            mean = csum / M
            # Single-pass E[x^2]-E[x]^2 in f32 (biased, training-mode BN); the clamp
            # guards tiny negative values from cancellation at large M.
            var = jnp.maximum(csq / M - mean * mean, 0.0)
            gamma = jnp.zeros((Np,), jnp.float32).at[:cout].set(layer["gamma"])
            beta = jnp.zeros((Np,), jnp.float32).at[:cout].set(layer["beta"])
            scale = gamma * jax.lax.rsqrt(var + 1e-5)
            shift = beta - mean * scale
            # TODO(synk): fold scale/shift+LeakyReLU into the next layer's A-tile
            # load (needs a padding-aware mask for the im2col border zeros).
            y = pallas_scale_shift_lrelu(y, scale, shift, out_dtype=jnp.bfloat16)
        else:
            act = "none" if is_last else "lrelu"
            out_dtype = jnp.float32 if is_last else jnp.bfloat16
            y = pallas_conv_matmul(patches, wm, layer["b"], act=act,
                                   compute_stats=False, out_dtype=out_dtype)

        x = y[:, :cout].reshape(B, Do, Ho, Wo, cout)      # stays channels-last
    return x


# ----------------------------------------------------------------------------
# DiceLossWithDiscriminator forward
# ----------------------------------------------------------------------------
def dice_loss_with_discriminator_forward(
        disc_weights, disc_cfg, inputs, reconstructions, optimizer_idx, global_step,
        disc_start=0, disc_factor=1.0, generator_weight=1.0, split="train",
        compute_g_logits=False):
    # rec_loss = DiceLoss(to_onehot_y=False, sigmoid=True)(recon, inputs) * 0.4
    dice = pallas_dice_loss_sigmoid(reconstructions, inputs)
    rec_loss = dice * 0.4
    nll_loss = rec_loss  # scalar; torch.mean of a scalar is itself

    if optimizer_idx == 0:
        if compute_g_logits:
            logits_fake = discriminator_forward(disc_weights, disc_cfg, reconstructions)
            g_loss = -pallas_mean(logits_fake)
        else:
            # g_weight is hard-coded 0 below, so the discriminator forward would only
            # produce the g_loss log entry — skipped by default (largest single saving
            # on the generator step). Pass compute_g_logits=True to restore it.
            g_loss = jnp.asarray(0.0, jnp.float32)
        # TODO(synk): calculate_adaptive_weight needs torch.autograd.grad through the
        # decoder's last layer (not available in this standalone loss); this reproduces
        # the RuntimeError/except fallback path (eval mode) => g_weight = 0.0.
        g_weight = jnp.asarray(0.0, jnp.float32) * generator_weight
        df = adopt_weight(disc_factor, global_step, threshold=disc_start)
        loss = nll_loss + g_weight * df * g_loss
        log = {
            f"{split}/total_loss": loss,
            f"{split}/nll_loss": nll_loss,
            f"{split}/rec_loss": rec_loss,
            f"{split}/g_weight": g_weight,
            f"{split}/g_loss": g_loss,
        }
        return loss, log

    if optimizer_idx == 1:
        # Real and fake go through the discriminator SEPARATELY (as in PyTorch):
        # BatchNorm training-mode batch statistics would change if concatenated.
        logits_real = discriminator_forward(disc_weights, disc_cfg, inputs)
        logits_fake = discriminator_forward(disc_weights, disc_cfg, reconstructions)
        mean_real, mean_fake, hinge = pallas_logits_stats(logits_real, logits_fake)
        df = adopt_weight(disc_factor, global_step, threshold=disc_start)
        d_loss = df * hinge
        log = {
            f"{split}/disc_loss": d_loss,
            f"{split}/logits_real": mean_real,
            f"{split}/logits_fake": mean_fake,
        }
        return d_loss, log

    raise ValueError(f"optimizer_idx must be 0 or 1, got {optimizer_idx}")


# ----------------------------------------------------------------------------
if __name__ == "__main__":
    key = jax.random.PRNGKey(0)
    k_in, k_rec, k_params = jax.random.split(key, 3)

    # Small config: disc_in_channels=3, disc_ndf=8, disc_num_layers=2, 16^3 volumes.
    B, C, D, H, W = 2, 3, 16, 16, 16  # layout: NCDHW
    inputs = jax.random.normal(k_in, (B, C, D, H, W), jnp.float32)
    reconstructions = jax.random.normal(k_rec, (B, C, D, H, W), jnp.float32)

    disc_weights, disc_cfg = init_discriminator_params(
        k_params, input_nc=C, ndf=8, n_layers=2)

    fwd_g = jax.jit(lambda w, x, r, s: dice_loss_with_discriminator_forward(
        w, disc_cfg, x, r, optimizer_idx=0, global_step=s, disc_start=0))
    fwd_g_logits = jax.jit(lambda w, x, r, s: dice_loss_with_discriminator_forward(
        w, disc_cfg, x, r, optimizer_idx=0, global_step=s, disc_start=0,
        compute_g_logits=True))
    fwd_d = jax.jit(lambda w, x, r, s: dice_loss_with_discriminator_forward(
        w, disc_cfg, x, r, optimizer_idx=1, global_step=s, disc_start=0))

    loss_g, log_g = fwd_g(disc_weights, inputs, reconstructions, 10)
    loss_g2, log_g2 = fwd_g_logits(disc_weights, inputs, reconstructions, 10)
    loss_d, log_d = fwd_d(disc_weights, inputs, reconstructions, 10)

    jax.block_until_ready((loss_g, loss_g2, loss_d, log_g, log_g2, log_d))
    print("KERNEL_OK")
</pallas_src>

<mosaic_0001>
module attributes {stable_mosaic.version = 11 : i64} {
  func.func @_dice_partial_kernel(%arg0: i32, %arg1: i32, %arg2: memref<6x4096xf32, #tpu.memory_space<vmem>>, %arg3: memref<6x4096xf32, #tpu.memory_space<vmem>>, %arg4: memref<1x6x1xf32, #tpu.memory_space<vmem>>, %arg5: memref<1x6x1xf32, #tpu.memory_space<vmem>>, %arg6: memref<1x6x1xf32, #tpu.memory_space<vmem>>) attributes {dimension_semantics = [#tpu.dimension_semantics<parallel>, #tpu.dimension_semantics<arbitrary>], iteration_bounds = array<i64: 1, 1>, scalar_prefetch = 0 : i64, scratch_operands = 0 : i64, tpu.core_type = #tpu.core_type<tc>, window_params = [{transform_indices = @transform_0, window_bounds = array<i64: 6, 4096>}, {transform_indices = @transform_1, window_bounds = array<i64: 6, 4096>}, {transform_indices = @transform_2, window_bounds = array<i64: 1, 6, 1>}, {transform_indices = @transform_3, window_bounds = array<i64: 1, 6, 1>}, {transform_indices = @transform_4, window_bounds = array<i64: 1, 6, 1>}]} {
    %c1_i32 = arith.constant 1 : i32
    %0 = arith.muli %arg0, %c1_i32 : i32
    %1 = arith.addi %0, %arg1 : i32
    %c0_i32 = arith.constant 0 : i32
    %2 = arith.cmpi eq, %arg1, %c0_i32 : i32
    %3 = arith.extui %2 : i1 to i32
    %c0_i32_0 = arith.constant 0 : i32
    %4 = arith.cmpi ne, %3, %c0_i32_0 : i32
    scf.if %4 {
      %cst_28 = arith.constant 0.000000e+00 : f32
      %41 = vector.broadcast %cst_28 : f32 to vector<1x6x1xf32>
      %c0_29 = arith.constant 0 : index
      %c0_30 = arith.constant 0 : index
      %c0_31 = arith.constant 0 : index
      %42 = vector.load %arg4[%c0_29, %c0_30, %c0_31] : memref<1x6x1xf32, #tpu.memory_space<vmem>>, vector<1x6x1xf32>
      tpu.vector_store %arg4[%c0_29, %c0_30, %c0_31], %41 {strides = array<i32>} : memref<1x6x1xf32, #tpu.memory_space<vmem>>, vector<1x6x1xf32>,
      %cst_32 = arith.constant 0.000000e+00 : f32
      %43 = vector.broadcast %cst_32 : f32 to vector<1x6x1xf32>
      %c0_33 = arith.constant 0 : index
      %c0_34 = arith.constant 0 : index
      %c0_35 = arith.constant 0 : index
      %44 = vector.load %arg5[%c0_33, %c0_34, %c0_35] : memref<1x6x1xf32, #tpu.memory_space<vmem>>, vector<1x6x1xf32>
      tpu.vector_store %arg5[%c0_33, %c0_34, %c0_35], %43 {strides = array<i32>} : memref<1x6x1xf32, #tpu.memory_space<vmem>>, vector<1x6x1xf32>,
      %cst_36 = arith.constant 0.000000e+00 : f32
      %45 = vector.broadcast %cst_36 : f32 to vector<1x6x1xf32>
      %c0_37 = arith.constant 0 : index
      %c0_38 = arith.constant 0 : index
      %c0_39 = arith.constant 0 : index
      %46 = vector.load %arg6[%c0_37, %c0_38, %c0_39] : memref<1x6x1xf32, #tpu.memory_space<vmem>>, vector<1x6x1xf32>
      tpu.vector_store %arg6[%c0_37, %c0_38, %c0_39], %45 {strides = array<i32>} : memref<1x6x1xf32, #tpu.memory_space<vmem>>, vector<1x6x1xf32>,
    } else {
    }
    %5 = tpu.iota {dimensions = array<i32: 1>} : vector<6x4096xi32>
    %c4096_i32 = arith.constant 4096 : i32
    %6 = arith.muli %1, %c4096_i32 : i32
    %7 = vector.broadcast %6 : i32 to vector<6x4096xi32>
    %8 = arith.addi %5, %7 : vector<6x4096xi32>
    %c4096_i32_1 = arith.constant 4096 : i32
    %9 = vector.broadcast %c4096_i32_1 : i32 to vector<6x4096xi32>
    %10 = arith.cmpi slt, %8, %9 : vector<6x4096xi32>
    %c0 = arith.constant 0 : index
    %c0_2 = arith.constant 0 : index
    %11 = vector.load %arg2[%c0, %c0_2] : memref<6x4096xf32, #tpu.memory_space<vmem>>, vector<6x4096xf32>
    %12 = arith.negf %11 : vector<6x4096xf32>
    %13 = math.exp %12 : vector<6x4096xf32>
    %cst = arith.constant 1.000000e+00 : f32
    %14 = vector.broadcast %cst : f32 to vector<6x4096xf32>
    %15 = arith.addf %14, %13 : vector<6x4096xf32>
    %16 = arith.divf %14, %15 : vector<6x4096xf32>
    %cst_3 = arith.constant 0.000000e+00 : f32
    %17 = vector.broadcast %cst_3 : f32 to vector<6x4096xf32>
    %18 = arith.select %10, %16, %17 : vector<6x4096xi1>, vector<6x4096xf32>
    %c0_4 = arith.constant 0 : index
    %c0_5 = arith.constant 0 : index
    %19 = vector.load %arg3[%c0_4, %c0_5] : memref<6x4096xf32, #tpu.memory_space<vmem>>, vector<6x4096xf32>
    %cst_6 = arith.constant 0.000000e+00 : f32
    %20 = vector.broadcast %cst_6 : f32 to vector<6x4096xf32>
    %21 = arith.select %10, %19, %20 : vector<6x4096xi1>, vector<6x4096xf32>
    %c0_7 = arith.constant 0 : index
    %c0_8 = arith.constant 0 : index
    %c0_9 = arith.constant 0 : index
    %22 = vector.load %arg4[%c0_7, %c0_8, %c0_9] : memref<1x6x1xf32, #tpu.memory_space<vmem>>, vector<1x6x1xf32>
    %23 = arith.mulf %18, %21 : vector<6x4096xf32>
    %cst_10 = arith.constant dense<0.000000e+00> : vector<6xf32>
    %24 = vector.multi_reduction <add>, %23, %cst_10 [1] : vector<6x4096xf32> to vector<6xf32>
    %25 = vector.shape_cast %24 : vector<6xf32> to vector<6x1xf32>
    %26 = vector.shape_cast %25 : vector<6x1xf32> to vector<1x6x1xf32>
    %27 = arith.addf %22, %26 : vector<1x6x1xf32>
    %c0_11 = arith.constant 0 : index
    %c0_12 = arith.constant 0 : index
    %c0_13 = arith.constant 0 : index
    %28 = vector.load %arg4[%c0_11, %c0_12, %c0_13] : memref<1x6x1xf32, #tpu.memory_space<vmem>>, vector<1x6x1xf32>
    tpu.vector_store %arg4[%c0_11, %c0_12, %c0_13], %27 {strides = array<i32>} : memref<1x6x1xf32, #tpu.memory_space<vmem>>, vector<1x6x1xf32>,
    %c0_14 = arith.constant 0 : index
    %c0_15 = arith.constant 0 : index
    %c0_16 = arith.constant 0 : index
    %29 = vector.load %arg5[%c0_14, %c0_15, %c0_16] : memref<1x6x1xf32, #tpu.memory_space<vmem>>, vector<1x6x1xf32>
    %cst_17 = arith.constant dense<0.000000e+00> : vector<6xf32>
    %30 = vector.multi_reduction <add>, %18, %cst_17 [1] : vector<6x4096xf32> to vector<6xf32>
    %31 = vector.shape_cast %30 : vector<6xf32> to vector<6x1xf32>
    %32 = vector.shape_cast %31 : vector<6x1xf32> to vector<1x6x1xf32>
    %33 = arith.addf %29, %32 : vector<1x6x1xf32>
    %c0_18 = arith.constant 0 : index
    %c0_19 = arith.constant 0 : index
    %c0_20 = arith.constant 0 : index
    %34 = vector.load %arg5[%c0_18, %c0_19, %c0_20] : memref<1x6x1xf32, #tpu.memory_space<vmem>>, vector<1x6x1xf32>
    tpu.vector_store %arg5[%c0_18, %c0_19, %c0_20], %33 {strides = array<i32>} : memref<1x6x1xf32, #tpu.memory_space<vmem>>, vector<1x6x1xf32>,
    %c0_21 = arith.constant 0 : index
    %c0_22 = arith.constant 0 : index
    %c0_23 = arith.constant 0 : index
    %35 = vector.load %arg6[%c0_21, %c0_22, %c0_23] : memref<1x6x1xf32, #tpu.memory_space<vmem>>, vector<1x6x1xf32>
    %cst_24 = arith.constant dense<0.000000e+00> : vector<6xf32>
    %36 = vector.multi_reduction <add>, %21, %cst_24 [1] : vector<6x4096xf32> to vector<6xf32>
    %37 = vector.shape_cast %36 : vector<6xf32> to vector<6x1xf32>
    %38 = vector.shape_cast %37 : vector<6x1xf32> to vector<1x6x1xf32>
    %39 = arith.addf %35, %38 : vector<1x6x1xf32>
    %c0_25 = arith.constant 0 : index
    %c0_26 = arith.constant 0 : index
    %c0_27 = arith.constant 0 : index
    %40 = vector.load %arg6[%c0_25, %c0_26, %c0_27] : memref<1x6x1xf32, #tpu.memory_space<vmem>>, vector<1x6x1xf32>
    tpu.vector_store %arg6[%c0_25, %c0_26, %c0_27], %39 {strides = array<i32>} : memref<1x6x1xf32, #tpu.memory_space<vmem>>, vector<1x6x1xf32>,
    return
  }
  func.func @transform_0(%arg0: i32, %arg1: i32) -> (i32, i32) {
    %c1_i32 = arith.constant 1 : i32
    %0 = arith.muli %arg0, %c1_i32 : i32
    %1 = arith.addi %0, %arg1 : i32
    %c0_i32 = arith.constant 0 : i32
    %2 = arith.minsi %1, %c0_i32 : i32
    %c0_i32_0 = arith.constant 0 : i32
    %c0_i32_1 = arith.constant 0 : i32
    return %c0_i32_0, %2 : i32, i32
  }
  func.func @transform_1(%arg0: i32, %arg1: i32) -> (i32, i32) {
    %c1_i32 = arith.constant 1 : i32
    %0 = arith.muli %arg0, %c1_i32 : i32
    %1 = arith.addi %0, %arg1 : i32
    %c0_i32 = arith.constant 0 : i32
    %2 = arith.minsi %1, %c0_i32 : i32
    %c0_i32_0 = arith.constant 0 : i32
    %c0_i32_1 = arith.constant 0 : i32
    return %c0_i32_0, %2 : i32, i32
  }
  func.func @transform_2(%arg0: i32, %arg1: i32) -> (i32, i32, i32) {
    %c0_i32 = arith.constant 0 : i32
    %c0_i32_0 = arith.constant 0 : i32
    %c0_i32_1 = arith.constant 0 : i32
    return %arg0, %c0_i32, %c0_i32_0 : i32, i32, i32
  }
  func.func @transform_3(%arg0: i32, %arg1: i32) -> (i32, i32, i32) {
    %c0_i32 = arith.constant 0 : i32
    %c0_i32_0 = arith.constant 0 : i32
    %c0_i32_1 = arith.constant 0 : i32
    return %arg0, %c0_i32, %c0_i32_0 : i32, i32, i32
  }
  func.func @transform_4(%arg0: i32, %arg1: i32) -> (i32, i32, i32) {
    %c0_i32 = arith.constant 0 : i32
    %c0_i32_0 = arith.constant 0 : i32
    %c0_i32_1 = arith.constant 0 : i32
    return %arg0, %c0_i32, %c0_i32_0 : i32, i32, i32
  }
}

</mosaic_0001>

<bundles_post_ra>
// kernel: _lambda_.1
= control target key start
LH: loop header
LB: loop body
LE: loop exit
PB: predicated region body
PF: predicated region fallthrough
CT: control target
= control target key end

     0   :  { %vm539_vm0 = vcmask 1045504   ;;  %vm83_vm1 = vcmask 5120   ;;  %s1563_s0 = inlined_call_operand.vmem [shape: f32[6,4096], index: 0, kind: input, shape index: {}]   ;;  %s1564_s1 = inlined_call_operand.vmem [shape: f32[6,4096], index: 1, kind: input, shape index: {}]   ;;  %s1565_s2 = inlined_call_operand.vmem [shape: f32[1,6,1], index: 2, kind: output, shape index: {0}]   ;;  %s1566_s3 = inlined_call_operand.vmem [shape: f32[1,6,1], index: 3, kind: output, shape index: {1}]   ;;  %s1567_s4 = inlined_call_operand.vmem [shape: f32[1,6,1], index: 4, kind: output, shape index: {2}]  }
   0x1   :  { %v186_v0 = vld [vmem:[%s1563_s0] sm:$0x3f]  ;;  %v187_v1 = vld [vmem:[%s1563_s0 + $0x8] sm:$0x3f]  ;;  %v188_v2 = vld [vmem:[%s1563_s0 + $0x10] sm:$0x3f] }
   0x2   :  { %v189_v3 = vld [vmem:[%s1563_s0 + $0x18] sm:$0x3f]  ;;  %v768_v4 = vmul.f32 -1.442695, %v186_v0  ;;  %v190_v5 = vld [vmem:[%s1563_s0 + $0x20] sm:$0x3f] }
   0x3   :  { %v769_v6 = vmul.f32 -1.442695, %v187_v1  ;;  %v191_v7 = vld [vmem:[%s1563_s0 + $0x28] sm:$0x3f]  ;;  %v770_v8 = vmul.f32 -1.442695, %v188_v2 }
   0x4   :  { %v192_v9 = vld [vmem:[%s1563_s0 + $0x30] sm:$0x3f]  ;;  %v771_v10 = vmul.f32 -1.442695, %v189_v3  ;;  %v193_v11 = vld [vmem:[%s1563_s0 + $0x38] sm:$0x3f]  ;;  %801 = vpow2.f32 %v768_v4 }
   0x5   :  { %v772_v12 = vmul.f32 -1.442695, %v190_v5  ;;  %v194_v13 = vld [vmem:[%s1563_s0 + $0x40] sm:$0x3f]  ;;  %803 = vpow2.f32 %v769_v6  ;;  %v773_v14 = vmul.f32 -1.442695, %v191_v7 }
   0x6   :  { %v195_v15 = vld [vmem:[%s1563_s0 + $0x48] sm:$0x3f]  ;;  %805 = vpow2.f32 %v770_v8  ;;  %v774_v16 = vmul.f32 -1.442695, %v192_v9  ;;  %v196_v17 = vld [vmem:[%s1563_s0 + $0x50] sm:$0x3f] }
   0x7   :  { %807 = vpow2.f32 %v771_v10  ;;  %v775_v18 = vmul.f32 -1.442695, %v193_v11  ;;  %v197_v19 = vld [vmem:[%s1563_s0 + $0x58] sm:$0x3f]  ;;  %v776_v20 = vmul.f32 -1.442695, %v194_v13 }
   0x8   :  { %809 = vpow2.f32 %v772_v12  ;;  %v198_v21 = vld [vmem:[%s1563_s0 + $0x60] sm:$0x3f]  ;;  %v777_v22 = vmul.f32 -1.442695, %v195_v15  ;;  %v199_v23 = vld [vmem:[%s1563_s0 + $0x68] sm:$0x3f] }
   0x9   :  { %811 = vpow2.f32 %v773_v14  ;;  %v200_v24 = vld [vmem:[%s1563_s0 + $0x70] sm:$0x3f]  ;;  %v778_v25 = vmul.f32 -1.442695, %v196_v17  ;;  %v201_v26 = vld [vmem:[%s1563_s0 + $0x78] sm:$0x3f] }
   0xa   :  { %813 = vpow2.f32 %v774_v16  ;;  %v202_v27 = vld [vmem:[%s1563_s0 + $0x80] sm:$0x3f]  ;;  %v779_v28 = vmul.f32 -1.442695, %v197_v19  ;;  %v203_v29 = vld [vmem:[%s1563_s0 + $0x88] sm:$0x3f] }
   0xb   :  { %815 = vpow2.f32 %v775_v18  ;;  %v780_v30 = vmul.f32 -1.442695, %v198_v21  ;;  %v1012_v31 = vld [vmem:[%s1564_s1] sm:$0x3f]  ;;  %v204_v32 = vld [vmem:[%s1563_s0 + $0x90] sm:$0x3f] }
   0xc   :  { %817 = vpow2.f32 %v776_v20  ;;  %v781_v33 = vmul.f32 -1.442695, %v199_v23  ;;  %v1020_v34 = vld [vmem:[%s1564_s1 + $0x8] sm:$0x3f]  ;;  %v677_v35 = vsel %vm539_vm0, %v1012_v31, 0.0 }
   0xd   :  { %819 = vpow2.f32 %v777_v22  ;;  %v782_v36 = vmul.f32 -1.442695, %v200_v24  ;;  %v1027_v37 = vld [vmem:[%s1564_s1 + $0x10] sm:$0x3f]  ;;  %v678_v38 = vsel %vm539_vm0, %v1020_v34, 0.0 }
   0xe   :  { %821 = vpow2.f32 %v778_v25  ;;  %v783_v39 = vmul.f32 -1.442695, %v201_v26  ;;  %v1034_v40 = vld [vmem:[%s1564_s1 + $0x18] sm:$0x3f]  ;;  %v679_v41 = vadd.f32 %v678_v38, %v677_v35  ;;  %v680_v42 = vsel %vm539_vm0, %v1027_v37, 0.0 }
   0xf   :  { %823 = vpow2.f32 %v779_v28  ;;  %v205_v43 = vld [vmem:[%s1563_s0 + $0x98] sm:$0x3f]  ;;  %v784_v44 = vmul.f32 -1.442695, %v202_v27  ;;  %v682_v45 = vsel %vm539_vm0, %v1034_v40, 0.0 }
  0x10   :  { %825 = vpow2.f32 %v780_v30  ;;  %v206_v47 = vld [vmem:[%s1563_s0 + $0xa0] sm:$0x3f]  ;;  %v785_v48 = vmul.f32 -1.442695, %v203_v29  ;;  %v681_v50 = vadd.f32 %v680_v42, %v679_v41  ;;  %v207_v52 = vld [vmem:[%s1563_s0 + $0xa8] sm:$0x3f] }
  0x11   :  { %v802_v46 = vpop.eup %801  ;;  %827 = vpow2.f32 %v781_v33  ;;  %v1049_v49 = vld [vmem:[%s1564_s1 + $0x20] sm:$0x3f]  ;;  %v786_v53 = vmul.f32 -1.442695, %v204_v32  ;;  %v208_v56 = vld [vmem:[%s1563_s0 + $0xb0] sm:$0x3f] }
  0x12   :  { %v804_v51 = vpop.eup %803  ;;  %829 = vpow2.f32 %v782_v36  ;;  %v684_v54 = vsel %vm539_vm0, %v1049_v49, 0.0  ;;  %v787_v57 = vmul.f32 -1.442695, %v205_v43  ;;  %v1062_v58 = vld [vmem:[%s1564_s1 + $0x28] sm:$0x3f]  ;;  %v683_v59 = vadd.f32 %v682_v45, %v681_v50 }
  0x13   :  { %v806_v55 = vpop.eup %805  ;;  %831 = vpow2.f32 %v783_v39  ;;  %v209_v61 = vld [vmem:[%s1563_s0 + $0xb8] sm:$0x3f]  ;;  %v788_v62 = vmul.f32 -1.442695, %v206_v47  ;;  %v686_v63 = vsel %vm539_vm0, %v1062_v58, 0.0  ;;  %v314_v25 = vadd.f32 1.0, %v802_v46 }
  0x14   :  { %v808_v60 = vpop.eup %807  ;;  %833 = vpow2.f32 %v784_v44  ;;  %v210_v1 = vld [vmem:[%s1563_s0 + $0xc0] sm:$0x3f]  ;;  %v789_v2 = vmul.f32 -1.442695, %v207_v52  ;;  %v1075_v3 = vld [vmem:[%s1564_s1 + $0x30] sm:$0x3f]  ;;  %v685_v4 = vadd.f32 %v684_v54, %v683_v59 }
  0x15   :  { %v810_v0 = vpop.eup %809  ;;  %835 = vpow2.f32 %v785_v48  ;;  %v211_v6 = vld [vmem:[%s1563_s0 + $0xc8] sm:$0x3f]  ;;  %v790_v7 = vmul.f32 -1.442695, %v208_v56  ;;  %v688_v8 = vsel %vm539_vm0, %v1075_v3, 0.0  ;;  %v315_v29 = vadd.f32 1.0, %v804_v51 }
  0x16   :  { %v812_v5 = vpop.eup %811  ;;  %837 = vpow2.f32 %v786_v53  ;;  %v212_v10 = vld [vmem:[%s1563_s0 + $0xd0] sm:$0x3f]  ;;  %v791_v11 = vmul.f32 -1.442695, %v209_v61  ;;  %v1088_v12 = vld [vmem:[%s1564_s1 + $0x38] sm:$0x3f]  ;;  %v687_v13 = vadd.f32 %v686_v63, %v685_v4 }
  0x17   :  { %v814_v9 = vpop.eup %813  ;;  %839 = vpow2.f32 %v787_v57  ;;  %v792_v15 = vmul.f32 -1.442695, %v210_v1  ;;  %v690_v16 = vsel %vm539_vm0, %v1088_v12, 0.0  ;;  %v793_v18 = vmul.f32 -1.442695, %v211_v6 }
  0x18   :  { %v816_v14 = vpop.eup %815  ;;  %841 = vpow2.f32 %v788_v62  ;;  %v1095_v19 = vld [vmem:[%s1564_s1 + $0x40] sm:$0x3f]  ;;  %v689_v20 = vadd.f32 %v688_v8, %v687_v13  ;;  %v794_v22 = vmul.f32 -1.442695, %v212_v10  ;;  %v1104_v26 = vld [vmem:[%s1564_s1 + $0x48] sm:$0x3f] }
  0x19   :  { %v818_v17 = vpop.eup %817  ;;  %843 = vpow2.f32 %v789_v2  ;;  %v692_v23 = vsel %vm539_vm0, %v1095_v19, 0.0  ;;  %v694_v30 = vsel %vm539_vm0, %v1104_v26, 0.0  ;;  %v316_v33 = vadd.f32 1.0, %v806_v55  ;;  %v1115_v35 = vld [vmem:[%s1564_s1 + $0x50] sm:$0x3f] }
  0x1a   :  { %v820_v21 = vpop.eup %819  ;;  %845 = vpow2.f32 %v790_v7  ;;  %v691_v27 = vadd.f32 %v690_v16, %v689_v20  ;;  %v317_v39 = vadd.f32 1.0, %v808_v60  ;;  %v696_v41 = vsel %vm539_vm0, %v1115_v35, 0.0  ;;  %v1126_v44 = vld [vmem:[%s1564_s1 + $0x58] sm:$0x3f]  ;;  %v1138_v53 = vld [vmem:[%s1564_s1 + $0x60] sm:$0x3f] }
  0x1b   :  { %v1099_v24 = vpop.eup %821  ;;  %847 = vpow2.f32 %v791_v11  ;;  %v318_v43 = vadd.f32 1.0, %v810_v0  ;;  %v213_v47 = vld [vmem:[%s1563_s0 + $0xd8] sm:$0x3f]  ;;  %v319_v48 = vadd.f32 1.0, %v812_v5  ;;  %v698_v50 = vsel %vm539_vm0, %v1126_v44, 0.0 }
  0x1c   :  { %v1106_v28 = vpop.eup %823  ;;  %849 = vpow2.f32 %v792_v15  ;;  %v693_v36 = vadd.f32 %v692_v23, %v691_v27  ;;  %v320_v52 = vadd.f32 1.0, %v814_v9  ;;  %v214_v56 = vld [vmem:[%s1563_s0 + $0xe0] sm:$0x3f]  ;;  %v321_v57 = vadd.f32 1.0, %v816_v14  ;;  %v1152_v62 = vld [vmem:[%s1564_s1 + $0x68] sm:$0x3f] }
  0x1d   :  { %v1110_v32 = vpop.eup %825  ;;  %851 = vpow2.f32 %v793_v18  ;;  %v700_v59 = vsel %vm539_vm0, %v1138_v53, 0.0  ;;  %v795_v61 = vmul.f32 -1.442695, %v213_v47  ;;  %v215_v1 = vld [vmem:[%s1563_s0 + $0xe8] sm:$0x3f]  ;;  %v322_v2 = vadd.f32 1.0, %v818_v17 }
  0x1e   :  { %v1117_v38 = vpop.eup %827  ;;  %853 = vpow2.f32 %v794_v22  ;;  %v695_v45 = vadd.f32 %v694_v30, %v693_v36  ;;  %v702_v4 = vsel %vm539_vm0, %v1152_v62, 0.0  ;;  %v796_v6 = vmul.f32 -1.442695, %v214_v56  ;;  %v1166_v7 = vld [vmem:[%s1564_s1 + $0x70] sm:$0x3f] }
  0x1f   :  { %v1121_v42 = vpop.eup %829  ;;  %855 = vrcp.f32 %v314_v25  ;;  %v216_v10 = vld [vmem:[%s1563_s0 + $0xf0] sm:$0x3f]  ;;  %v323_v11 = vadd.f32 1.0, %v820_v21  ;;  %v704_v13 = vsel %vm539_vm0, %v1166_v7, 0.0  ;;  %v217_v15 = vld [vmem:[%s1563_s0 + $0xf8] sm:$0x3f] }
  0x20   :  { %v832_v46 = vpop.eup %831  ;;  %857 = vrcp.f32 %v315_v29  ;;  %v697_v54 = vadd.f32 %v696_v41, %v695_v45  ;;  %v797_v16 = vmul.f32 -1.442695, %v215_v1  ;;  %v1183_v17 = vld [vmem:[%s1564_s1 + $0x78] sm:$0x3f]  ;;  %v324_v21 = vadd.f32 1.0, %v1099_v24 }
  0x21   :  { %v1133_v51 = vpop.eup %833  ;;  %859 = vrcp.f32 %v316_v33  ;;  %v706_v22 = vsel %vm539_vm0, %v1183_v17, 0.0  ;;  %v798_v25 = vmul.f32 -1.442695, %v216_v10  ;;  %v1195_v27 = vld [vmem:[%s1564_s1 + $0x80] sm:$0x3f]  ;;  %v325_v36 = vadd.f32 1.0, %v1106_v28 }
  0x22   :  { %v1140_v55 = vpop.eup %835  ;;  %861 = vrcp.f32 %v317_v39  ;;  %v699_v63 = vadd.f32 %v698_v50, %v697_v54  ;;  %v799_v33 = vmul.f32 -1.442695, %v217_v15  ;;  %v708_v24 = vsel %vm539_vm0, %v1195_v27, 0.0  ;;  %v1209_v45 = vld [vmem:[%s1564_s1 + $0x88] sm:$0x3f] }
  0x23   :  { %v1147_v60 = vpop.eup %837  ;;  %863 = vrcp.f32 %v318_v43  ;;  %v326_v41 = vadd.f32 1.0, %v1110_v32  ;;  %v327_v43 = vadd.f32 1.0, %v1117_v38  ;;  %v328_v28 = vadd.f32 1.0, %v1121_v42  ;;  %v1224_v54 = vld [vmem:[%s1564_s1 + $0x98] sm:$0x3f] }
  0x24   :  { %v1154_v0 = vpop.eup %839  ;;  %865 = vrcp.f32 %v319_v48  ;;  %v701_v8 = vadd.f32 %v700_v59, %v699_v63  ;;  %v329_v50 = vadd.f32 1.0, %v832_v46  ;;  %v710_v32 = vsel %vm539_vm0, %v1209_v45, 0.0 }
  0x25   :  { %v1161_v5 = vpop.eup %841  ;;  %867 = vrcp.f32 %v320_v52  ;;  %v1217_v52 = vld [vmem:[%s1564_s1 + $0x90] sm:$0x3f]  ;;  %v330_v59 = vadd.f32 1.0, %v1133_v51  ;;  %v714_v63 = vsel %vm539_vm0, %v1224_v54, 0.0 }
  0x26   :  { %v1168_v9 = vpop.eup %843  ;;  %869 = vrcp.f32 %v321_v57  ;;  %v703_v18 = vadd.f32 %v702_v4, %v701_v8  ;;  %v712_v56 = vsel %vm539_vm0, %v1217_v52, 0.0 }
  0x27   :  { %v1175_v14 = vpop.eup %845  ;;  %871 = vpow2.f32 %v795_v61 }
  0x28   :  { %v1185_v20 = vpop.eup %847  ;;  %873 = vrcp.f32 %v322_v2  ;;  %v705_v29 = vadd.f32 %v704_v13, %v703_v18  ;;  %v331_v13 = vadd.f32 1.0, %v1140_v55 }
  0x29   :  { %v1190_v23 = vpop.eup %849  ;;  %875 = vpow2.f32 %v796_v6 }
  0x2a   :  { %v1197_v30 = vpop.eup %851  ;;  %877 = vrcp.f32 %v323_v11  ;;  %v707_v47 = vadd.f32 %v706_v22, %v705_v29  ;;  %v332_v29 = vadd.f32 1.0, %v1147_v60 }
  0x2b   :  { %v1202_v39 = vpop.eup %853  ;;  %879 = vpow2.f32 %v797_v16 }
  0x2c   :  { %v1211_v48 = vpop.eup %855  ;;  %881 = vrcp.f32 %v324_v21  ;;  %v709_v46 = vadd.f32 %v708_v24, %v707_v47  ;;  %v1269_v21 = vld [vmem:[%s1564_s1 + $0xb0] sm:$0x3f] }
  0x2d   :  { %v858_v38 = vpop.eup %857  ;;  %883 = vpow2.f32 %v798_v25  ;;  %v507_v42 = vmul.f32 %v1211_v48, %v1012_v31  ;;  %v1241_v31 = vld [vmem:[%s1564_s1 + $0xa0] sm:$0x3f]  ;;  %v720_v24 = vsel %vm539_vm0, %v1269_v21, 0.0 }
  0x2e   :  { %v1230_v57 = vpop.eup %859  ;;  %885 = vrcp.f32 %v325_v36  ;;  %v508_v61 = vmul.f32 %v858_v38, %v1020_v34  ;;  %v711_v51 = vadd.f32 %v710_v32, %v709_v46  ;;  %v716_v10 = vsel %vm539_vm0, %v1241_v31, 0.0 }
  0x2f   :  { %v1236_v1 = vpop.eup %861  ;;  %887 = vpow2.f32 %v799_v33  ;;  %v509_v2 = vmul.f32 %v1230_v57, %v1027_v37  ;;  %v540_v4 = vsel %vm539_vm0, %v507_v42, 0.0 }
  0x30   :  { %v1246_v6 = vpop.eup %863  ;;  %889 = vrcp.f32 %v326_v41  ;;  %v510_v34 = vmul.f32 %v1236_v1, %v1034_v40  ;;  %v541_v8 = vsel %vm539_vm0, %v508_v61, 0.0  ;;  %v1264_v40 = vld [vmem:[%s1564_s1 + $0xa8] sm:$0x3f]  ;;  %v713_v22 = vadd.f32 %v712_v56, %v711_v51 }
  0x31   :  { %v1253_v11 = vpop.eup %865  ;;  %v511_v37 = vmul.f32 %v1246_v6, %v1049_v49  ;;  %v542_v15 = vadd.f32 %v541_v8, %v540_v4  ;;  %v543_v16 = vsel %vm539_vm0, %v509_v2, 0.0  ;;  %891 = vrcp.f32 %v327_v43  ;;  %v1291_v43 = vld [vmem:[%s1564_s1 + $0xc0] sm:$0x3f] }
  0x32   :  { %v1259_v18 = vpop.eup %867  ;;  %v512_v55 = vmul.f32 %v1253_v11, %v1062_v58  ;;  %v545_v49 = vsel %vm539_vm0, %v510_v34, 0.0  ;;  %v718_v36 = vsel %vm539_vm0, %v1264_v40, 0.0  ;;  %893 = vrcp.f32 %v328_v28  ;;  %v1286_v58 = vld [vmem:[%s1564_s1 + $0xb8] sm:$0x3f] }
  0x33   :  { %v1274_v25 = vpop.eup %869  ;;  %v544_v33 = vadd.f32 %v543_v16, %v542_v15  ;;  %v513_v60 = vmul.f32 %v1259_v18, %v1075_v3  ;;  %v547_v47 = vsel %vm539_vm0, %v511_v37, 0.0  ;;  %v715_v32 = vadd.f32 %v714_v63, %v713_v22  ;;  %v1308_v3 = vld [vmem:[%s1564_s1 + $0xc8] sm:$0x3f] }
  0x34   :  { %v1281_v41 = vpop.eup %871  ;;  %v333_v28 = vadd.f32 1.0, %v1154_v0  ;;  %v722_v56 = vsel %vm539_vm0, %v1286_v58, 0.0  ;;  %v724_v61 = vsel %vm539_vm0, %v1291_v43, 0.0  ;;  %895 = vrcp.f32 %v329_v50 }
  0x35   :  { %v1296_v42 = vpop.eup %873  ;;  %v546_v46 = vadd.f32 %v545_v49, %v544_v33  ;;  %v514_v63 = vmul.f32 %v1274_v25, %v1088_v12  ;;  %v549_v0 = vsel %vm539_vm0, %v512_v55, 0.0  ;;  %v717_v4 = vadd.f32 %v716_v10, %v715_v32  ;;  %v1325_v12 = vld [vmem:[%s1564_s1 + $0xd0] sm:$0x3f] }
  0x36   :  { %v1303_v2 = vpop.eup %875  ;;  %v726_v8 = vsel %vm539_vm0, %v1308_v3, 0.0  ;;  %v609_v50 = vsel %vm539_vm0, %v1211_v48, 0.0  ;;  %v610_v37 = vsel %vm539_vm0, %v858_v38, 0.0  ;;  %897 = vrcp.f32 %v330_v59 }
  0x37   :  { %v1313_v51 = vpop.eup %877  ;;  %v548_v34 = vadd.f32 %v547_v47, %v546_v46  ;;  %v515_v10 = vmul.f32 %v1296_v42, %v1095_v19  ;;  %v551_v16 = vsel %vm539_vm0, %v513_v60, 0.0  ;;  %v719_v55 = vadd.f32 %v718_v36, %v717_v4  ;;  %v1341_v19 = vld [vmem:[%s1564_s1 + $0xd8] sm:$0x3f]  ;;  %v1346_v36 = vld [vmem:[%s1564_s1 + $0xe0] sm:$0x3f] }
  0x38   :  { %v1320_v15 = vpop.eup %879  ;;  %v334_v48 = vadd.f32 1.0, %v1161_v5  ;;  %v335_v38 = vadd.f32 1.0, %v1168_v9  ;;  %v728_v59 = vsel %vm539_vm0, %v1325_v12, 0.0  ;;  %899 = vrcp.f32 %v331_v13 }
  0x39   :  { %v1330_v49 = vpop.eup %881  ;;  %v550_v22 = vadd.f32 %v549_v0, %v548_v34  ;;  %v516_v5 = vmul.f32 %v1313_v51, %v1104_v26  ;;  %v553_v9 = vsel %vm539_vm0, %v514_v63, 0.0  ;;  %v721_v60 = vadd.f32 %v720_v24, %v719_v55  ;;  %v1362_v26 = vld [vmem:[%s1564_s1 + $0xe8] sm:$0x3f] }
  0x3a   :  { %v1336_v33 = vpop.eup %883  ;;  %v730_v13 = vsel %vm539_vm0, %v1341_v19, 0.0  ;;  %v732_v46 = vsel %vm539_vm0, %v1346_v36, 0.0  ;;  %v611_v0 = vadd.f32 %v610_v37, %v609_v50  ;;  %901 = vrcp.f32 %v332_v29  ;;  %1570 = vst [vmem:[#allocation2_spill] sm:$0xff] %v1362_v26 }
  0x3b   :  { %v1351_v47 = vpop.eup %885  ;;  %v552_v32 = vadd.f32 %v551_v16, %v550_v22  ;;  %v517_v24 = vmul.f32 %v1330_v49, %v1115_v35  ;;  %v555_v63 = vsel %vm539_vm0, %v515_v10, 0.0  ;;  %v723_v34 = vadd.f32 %v722_v56, %v721_v60  ;;  %v1376_v22 = vld [vmem:[%s1564_s1 + $0xf0] sm:$0x3f] }
  0x3c   :  { %v1357_v4 = vpop.eup %887  ;;  %v336_v55 = vadd.f32 1.0, %v1175_v14  ;;  %v337_v50 = vadd.f32 1.0, %v1185_v20  ;;  %v734_v29 = vsel %vm539_vm0, %v1362_v26, 0.0  ;;  %903 = vrcp.f32 %v333_v28  ;;  %1571 = vst [vmem:[#allocation3_spill] sm:$0xff] %v1376_v22 }
  0x3d   :  { %v1367_v16 = vpop.eup %889  ;;  %v554_v37 = vadd.f32 %v553_v9, %v552_v32  ;;  %v518_v35 = vmul.f32 %v1351_v47, %v1126_v44  ;;  %v557_v56 = vsel %vm539_vm0, %v516_v5, 0.0  ;;  %v725_v10 = vadd.f32 %v724_v61, %v723_v34  ;;  %v1390_v9 = vld [vmem:[%s1564_s1 + $0xf8] sm:$0x3f] }
  0x3e   :  { %v1381_v60 = vpop.eup %891  ;;  %905 = vrcp.f32 %v334_v48  ;;  %v736_v20 = vsel %vm539_vm0, %v1376_v22, 0.0  ;;  %v612_v28 = vsel %vm539_vm0, %v1230_v57, 0.0  ;;  %v519_v44 = vmul.f32 %v1367_v16, %v1138_v53 }
  0x3f   :  { %v556_v14 = vadd.f32 %v555_v63, %v554_v37  ;;  %v559_v61 = vsel %vm539_vm0, %v517_v24, 0.0  ;;  %v727_v5 = vadd.f32 %v726_v8, %v725_v10  ;;  %v613_v32 = vadd.f32 %v612_v28, %v611_v0  ;;  %v1395_v48 = vpop.eup %893 }
  0x40   :  { %907 = vrcp.f32 %v335_v38  ;;  %v738_v34 = vsel %vm539_vm0, %v1390_v9, 0.0  ;;  %v614_v57 = vsel %vm539_vm0, %v1236_v1, 0.0  ;;  %v520_v37 = vmul.f32 %v1381_v60, %v1152_v62 }
  0x41   :  { %v558_v63 = vadd.f32 %v557_v56, %v556_v14  ;;  %v561_v22 = vsel %vm539_vm0, %v518_v35, 0.0  ;;  %v729_v53 = vadd.f32 %v728_v59, %v727_v5  ;;  %v615_v26 = vadd.f32 %v614_v57, %v613_v32  ;;  %v1404_v24 = vpop.eup %895 }
  0x42   :  { %v338_v8 = vadd.f32 1.0, %v1190_v23  ;;  %909 = vrcp.f32 %v336_v55  ;;  %v616_v0 = vsel %vm539_vm0, %v1246_v6, 0.0  ;;  %v521_v56 = vmul.f32 %v1395_v48, %v1166_v7 }
  0x43   :  { %v560_v38 = vadd.f32 %v559_v61, %v558_v63  ;;  %v563_v1 = vsel %vm539_vm0, %v519_v44, 0.0  ;;  %v731_v10 = vadd.f32 %v730_v13, %v729_v53  ;;  %v617_v62 = vadd.f32 %v616_v0, %v615_v26  ;;  %v1412_v14 = vpop.eup %897 }
  0x44   :  { %v339_v59 = vadd.f32 1.0, %v1197_v30  ;;  %911 = vrcp.f32 %v337_v50  ;;  %v618_v23 = vsel %vm539_vm0, %v1253_v11, 0.0  ;;  %v522_v55 = vmul.f32 %v1404_v24, %v1183_v17 }
  0x45   :  { %v562_v35 = vadd.f32 %v561_v22, %v560_v38  ;;  %v565_v6 = vsel %vm539_vm0, %v520_v37, 0.0  ;;  %v733_v28 = vadd.f32 %v732_v46, %v731_v10  ;;  %v619_v7 = vadd.f32 %v618_v23, %v617_v62  ;;  %v1420_v61 = vpop.eup %899 }
  0x46   :  { %v340_v13 = vadd.f32 1.0, %v1202_v39  ;;  %913 = vrcp.f32 %v338_v8  ;;  %v620_v30 = vsel %vm539_vm0, %v1259_v18, 0.0  ;;  %v523_v50 = vmul.f32 %v1412_v14, %v1195_v27 }
  0x47   :  { %v564_v26 = vadd.f32 %v563_v1, %v562_v35  ;;  %v567_v11 = vsel %vm539_vm0, %v521_v56, 0.0  ;;  %v735_v22 = vadd.f32 %v734_v29, %v733_v28  ;;  %v621_v17 = vadd.f32 %v620_v30, %v619_v7  ;;  %v1428_v44 = vpop.eup %901 }
  0x48   :  { %v341_v46 = vadd.f32 1.0, %v1281_v41  ;;  %915 = vrcp.f32 %v339_v59  ;;  %v622_v39 = vsel %vm539_vm0, %v1274_v25, 0.0  ;;  %v524_v32 = vmul.f32 %v1420_v61, %v1209_v45 }
  0x49   :  { %v566_v5 = vadd.f32 %v565_v6, %v564_v26  ;;  %v569_v18 = vsel %vm539_vm0, %v522_v55, 0.0  ;;  %v737_v63 = vadd.f32 %v736_v20, %v735_v22  ;;  %v623_v27 = vadd.f32 %v622_v39, %v621_v17  ;;  %v1436_v57 = vpop.eup %903 }
  0x4a   :  { %v342_v29 = vadd.f32 1.0, %v1303_v2  ;;  %917 = vrcp.f32 %v340_v13  ;;  %v624_v41 = vsel %vm539_vm0, %v1296_v42, 0.0  ;;  %v525_v25 = vmul.f32 %v1428_v44, %v1217_v52 }
  0x4b   :  { %v568_v37 = vadd.f32 %v567_v11, %v566_v5  ;;  %v1441_v53 = vpop.eup %905  ;;  %v571_v45 = vsel %vm539_vm0, %v523_v50, 0.0  ;;  %v739_v8 = vadd.f32 %v738_v34, %v737_v63  ;;  %v625_v38 = vadd.f32 %v624_v41, %v623_v27 }
  0x4c   :  { %v343_v20 = vadd.f32 1.0, %v1320_v15  ;;  %v626_v2 = vsel %vm539_vm0, %v1313_v51, 0.0  ;;  %v628_v56 = vsel %vm539_vm0, %v1330_v49, 0.0  ;;  %919 = vrcp.f32 %v341_v46 }
  0x4d   :  { %v570_v0 = vadd.f32 %v569_v18, %v568_v37  ;;  %v1451_v1 = vpop.eup %907  ;;  %v526_v42 = vmul.f32 %v1436_v57, %v1224_v54  ;;  %v573_v52 = vsel %vm539_vm0, %v524_v32, 0.0  ;;  %740 = vadd.xlane.f32.xlu1 %v739_v8  ;;  %v627_v34 = vadd.f32 %v626_v2, %v625_v38 }
  0x4e   :  { %v344_v10 = vadd.f32 1.0, %v1336_v33  ;;  %v630_v62 = vsel %vm539_vm0, %v1351_v47, 0.0  ;;  %921 = vrcp.f32 %v342_v29  ;;  %v527_v49 = vmul.f32 %v1441_v53, %v1241_v31 }
  0x4f   :  { %v572_v15 = vadd.f32 %v571_v45, %v570_v0  ;;  %v1459_v51 = vpop.eup %909  ;;  %v575_v59 = vsel %vm539_vm0, %v525_v25, 0.0  ;;  %v629_v35 = vadd.f32 %v628_v56, %v627_v34  ;;  %v345_v54 = vadd.f32 1.0, %v1357_v4 }
  0x50   :  { %v632_v55 = vsel %vm539_vm0, %v1367_v16, 0.0  ;;  %923 = vrcp.f32 %v343_v20  ;;  %v528_v47 = vmul.f32 %v1451_v1, %v1264_v40  ;;  %v577_v6 = vsel %vm539_vm0, %v526_v42, 0.0 }
  0x51   :  { %v574_v23 = vadd.f32 %v573_v52, %v572_v15  ;;  %v1467_v33 = vpop.eup %911  ;;  %v631_v28 = vadd.f32 %v630_v62, %v629_v35  ;;  %v634_v31 = vsel %vm539_vm0, %v1381_v60, 0.0  ;;  %925 = vrcp.f32 %v344_v10  ;;  %v1572_v10 = vld [vmem:[#allocation2_spill] sm:$0xff]  ;;  %v1573_v35 = vld [vmem:[#allocation3_spill] sm:$0xff] }
  0x52   :  { %v529_v4 = vmul.f32 %v1459_v51, %v1269_v21  ;;  %v579_v16 = vsel %vm539_vm0, %v527_v49, 0.0  ;;  %v636_v40 = vsel %vm539_vm0, %v1395_v48, 0.0  ;;  %927 = vrcp.f32 %v345_v54 }
  0x53   :  { %v576_v7 = vadd.f32 %v575_v59, %v574_v23  ;;  %v1474_v13 = vpop.eup %913  ;;  %v633_v26 = vadd.f32 %v632_v55, %v631_v28  ;;  %v530_v11 = vmul.f32 %v1467_v33, %v1286_v58  ;;  %v581_v60 = vsel %vm539_vm0, %v528_v47, 0.0 }
  0x54   :  { %v638_v46 = vsel %vm539_vm0, %v1404_v24, 0.0  ;;  %v531_v5 = vmul.f32 %v1474_v13, %v1291_v43  ;;  %v583_v39 = vsel %vm539_vm0, %v529_v4, 0.0  ;;  %v640_v18 = vsel %vm539_vm0, %v1412_v14, 0.0 }
  0x55   :  { %v578_v30 = vadd.f32 %v577_v6, %v576_v7  ;;  %v916_v50 = vpop.eup %915  ;;  %v635_v22 = vadd.f32 %v634_v31, %v633_v26  ;;  %v585_v63 = vsel %vm539_vm0, %v530_v11, 0.0  ;;  %v642_v24 = vsel %vm539_vm0, %v1420_v61, 0.0 }
  0x56   :  { %v532_v58 = vmul.f32 %v916_v50, %v1308_v3  ;;  %v587_v43 = vsel %vm539_vm0, %v531_v5, 0.0  ;;  %v644_v14 = vsel %vm539_vm0, %v1428_v44, 0.0  ;;  %v646_v61 = vsel %vm539_vm0, %v1436_v57, 0.0 }
  0x57   :  { %v580_v17 = vadd.f32 %v579_v16, %v578_v30  ;;  %v918_v21 = vpop.eup %917  ;;  %v637_v32 = vadd.f32 %v636_v40, %v635_v22  ;;  %v648_v44 = vsel %vm539_vm0, %v1441_v53, 0.0  ;;  %v650_v57 = vsel %vm539_vm0, %v1451_v1, 0.0 }
  0x58   :  { %v533_v41 = vmul.f32 %v918_v21, %v1325_v12  ;;  %v589_v38 = vsel %vm539_vm0, %v532_v58, 0.0  ;;  %v652_v47 = vsel %vm539_vm0, %v1459_v51, 0.0  ;;  %v654_v31 = vsel %vm539_vm0, %v1467_v33, 0.0 }
  0x59   :  { %v582_v48 = vadd.f32 %v581_v60, %v580_v17  ;;  %v639_v27 = vadd.f32 %v638_v46, %v637_v32  ;;  %v920_v29 = vpop.eup %919  ;;  %v656_v26 = vsel %vm539_vm0, %v1474_v13, 0.0  ;;  %v660_v22 = vsel %vm539_vm0, %v918_v21, 0.0 }
  0x5a   :  { %v534_v3 = vmul.f32 %v920_v29, %v1341_v19  ;;  %v591_v56 = vsel %vm539_vm0, %v533_v41, 0.0  ;;  %v662_v33 = vsel %vm539_vm0, %v920_v29, 0.0  ;;  %v929_v21 = vmov 0.0  }
  0x5b   :  { %v584_v37 = vadd.f32 %v583_v39, %v582_v48  ;;  %v641_v25 = vadd.f32 %v640_v18, %v639_v27  ;;  %v922_v45 = vpop.eup %921  ;;  %84 = vst.msk [vmem:[%s1565_s2] sm:$0x3f] %vm83_vm1, %v929_v21  ;;  %85 = vst.msk [vmem:[%s1566_s3] sm:$0x3f] %vm83_vm1, %v929_v21 }
  0x5c   :  { %v535_v12 = vmul.f32 %v922_v45, %v1346_v36  ;;  %v593_v15 = vsel %vm539_vm0, %v534_v3, 0.0  ;;  %v664_v5 = vsel %vm539_vm0, %v922_v45, 0.0  ;;  %86 = vst.msk [vmem:[%s1567_s4] sm:$0x3f] %vm83_vm1, %v929_v21 }
  0x5d   :  { %v586_v8 = vadd.f32 %v585_v63, %v584_v37  ;;  %v643_v20 = vadd.f32 %v642_v24, %v641_v25  ;;  %v924_v0 = vpop.eup %923 }
  0x5e   :  { %v926_v52 = vpop.eup %925  ;;  %v536_v19 = vmul.f32 %v924_v0, %v1572_v10  ;;  %v595_v54 = vsel %vm539_vm0, %v535_v12, 0.0  ;;  %v666_v13 = vsel %vm539_vm0, %v924_v0, 0.0 }
  0x5f   :  { %v588_v2 = vadd.f32 %v587_v43, %v586_v8  ;;  %v645_v42 = vadd.f32 %v644_v14, %v643_v20  ;;  %v928_v49 = vpop.eup %927  ;;  %v537_v36 = vmul.f32 %v926_v52, %v1573_v35  ;;  %v668_v48 = vsel %vm539_vm0, %v926_v52, 0.0 }
  0x60   :  { %v538_v53 = vmul.f32 %v928_v49, %v1390_v9  ;;  %v597_v6 = vsel %vm539_vm0, %v536_v19, 0.0  ;;  %v658_v9 = vsel %vm539_vm0, %v916_v50, 0.0  ;;  %v670_v50 = vsel %vm539_vm0, %v928_v49, 0.0 }
  0x61   :  { %v590_v34 = vadd.f32 %v589_v38, %v588_v2  ;;  %v647_v62 = vadd.f32 %v646_v61, %v645_v42  ;;  %v599_v1 = vsel %vm539_vm0, %v537_v36, 0.0 }
  0x62   :  { %v601_v30 = vsel %vm539_vm0, %v538_v53, 0.0  ;;  %v506_v24 = vld [vmem:[%s1565_s2] sm:$0x3f] }
  0x63   :  { %v592_v59 = vadd.f32 %v591_v56, %v590_v34  ;;  %v649_v23 = vadd.f32 %v648_v44, %v647_v62  ;;  %v676_v27 = vld [vmem:[%s1567_s4] sm:$0x3f] }
  0x64   :  { %v608_v25 = vld [vmem:[%s1566_s3] sm:$0x3f] }
  0x65   :  { %v594_v55 = vadd.f32 %v593_v15, %v592_v59  ;;  %v651_v28 = vadd.f32 %v650_v57, %v649_v23 }
  0x67   :  { %v596_v7 = vadd.f32 %v595_v54, %v594_v55  ;;  %v653_v4 = vadd.f32 %v652_v47, %v651_v28 }
  0x69   :  { %v598_v16 = vadd.f32 %v597_v6, %v596_v7  ;;  %v655_v40 = vadd.f32 %v654_v31, %v653_v4 }
  0x6b   :  { %v600_v51 = vadd.f32 %v599_v1, %v598_v16  ;;  %v657_v11 = vadd.f32 %v656_v26, %v655_v40 }
  0x6d   :  { %v602_v60 = vadd.f32 %v601_v30, %v600_v51  ;;  %v659_v17 = vadd.f32 %v658_v9, %v657_v11 }
  0x6f   :  { %603 = vadd.xlane.f32.xlu0 %v602_v60  ;;  %v661_v46 = vadd.f32 %v660_v22, %v659_v17 }
  0x71   :  { %v663_v39 = vadd.f32 %v662_v33, %v661_v46 }
  0x73   :  { %v665_v32 = vadd.f32 %v664_v5, %v663_v39 }
  0x75   :  { %v667_v18 = vadd.f32 %v666_v13, %v665_v32 }
  0x77   :  { %v669_v58 = vadd.f32 %v668_v48, %v667_v18 }
  0x79   :  { %v671_v63 = vadd.f32 %v670_v50, %v669_v58 }
  0x7b   :  { %672 = vadd.xlane.f32.xlu0 %v671_v63 }
  0xd6   :  { %v741_v29 = vpop.xlane.xlu1 %740 }
  0xd7   :  { %v742_v37 = vadd.f32 %v741_v29, %v676_v27 }
  0xd9   :  { %743 = vst.msk [vmem:[%s1567_s4] sm:$0x3f] %vm83_vm1, %v742_v37 }
  0xf8   :  { %v604_v41 = vpop.xlane.xlu0 %603 }
  0xf9   :  { %v605_v43 = vadd.f32 %v604_v41, %v506_v24 }
  0xfb   :  { %607 = vst.msk [vmem:[%s1565_s2] sm:$0x3f] %vm83_vm1, %v605_v43 }
 0x104   :  { %v673_v45 = vpop.xlane.xlu0 %672 }
 0x105   :  { %v674_v8 = vadd.f32 %v673_v45, %v608_v25 }
 0x107   :  { %675 = vst.msk [vmem:[%s1566_s3] sm:$0x3f] %vm83_vm1, %v674_v8 }

</bundles_post_ra>
